<compile_context>
chip_gen: v7x
topology: tpu7x:2x2x1
jax: 0.10.0
libtpu: 0.0.40
codegen_flags: <defaults>
</compile_context>

<pallas_src>
import jax
import jax.numpy as jnp
from jax.experimental import pallas as pl
from jax.experimental.pallas import tpu as pltpu

SLAB_W = 128          # [ft: 0..64) | contact_force: 64..67) | zero pad: 67..128)
_FT_W = 64
_CF_W = 3


def _round_up(x, m):
    return ((x + m - 1) // m) * m


def force_mlp_kernel(in_ref, w1_ref, b1_ref, w2a_ref, w2b_ref, b2_ref,
                     x_ref, h_ref):
    slab = in_ref[...]                                  # (TILE_B, 128)

    # fc1 + ReLU.  w1 is zero-extended over the cf/pad columns, so the full
    # 128-wide slab can feed the MXU directly (no lane slicing, MXU has slack).
    h = jnp.dot(slab, w1_ref[...], preferred_element_type=jnp.float32)
    h = jnp.maximum(h + b1_ref[...], 0.0)               # f32 accumulate/bias

    # fc2 over cat([h, cf]):
    #   h @ W2a  +  slab @ W2b_pad  + b2
    # W2b_pad is (128, d_emb) with only rows 64:67 nonzero -> the cf term rides
    # the idle MXU instead of VPU broadcast-FMAs.
    x = jnp.dot(h.astype(w2a_ref.dtype), w2a_ref[...],
                preferred_element_type=jnp.float32)
    x = x + jnp.dot(slab, w2b_ref[...], preferred_element_type=jnp.float32)
    x = x + b2_ref[...]

    x_ref[...] = x.astype(x_ref.dtype)
    h_ref[...] = h.astype(h_ref.dtype)


def prepare_force_mlp_params(w1, b1, w2, b2, activation_dtype=jnp.float32):
    """One-time glue: torch-layout params -> kernel-layout device arrays.

    w1: [d_cnt, 64], b1: [d_cnt], w2: [d_emb, d_cnt+3], b2: [d_emb].
    """
    w1 = jnp.asarray(w1, jnp.float32)
    w2 = jnp.asarray(w2, jnp.float32)
    d_cnt = w1.shape[0]
    d_emb = w2.shape[0]
    wdt = jnp.dtype(activation_dtype)

    # fc1 weight zero-extended over the slab's [cf | pad] columns -> (128, d_cnt).
    w1_pad = jnp.zeros((SLAB_W, d_cnt), jnp.float32).at[:_FT_W, :].set(w1.T)
    # fc2 weight split at the concat boundary: rows applied to h, and rows
    # applied to cf zero-extended over the slab -> (128, d_emb).
    w2_t = w2.T                                          # (d_cnt+3, d_emb)
    w2a = w2_t[:d_cnt, :]
    w2b_pad = jnp.zeros((SLAB_W, d_emb), jnp.float32).at[
        _FT_W:_FT_W + _CF_W, :].set(w2_t[d_cnt:, :])

    return (w1_pad.astype(wdt),
            jnp.asarray(b1, jnp.float32).reshape(1, d_cnt),   # biases stay f32
            w2a.astype(wdt),
            w2b_pad.astype(wdt),
            jnp.asarray(b2, jnp.float32).reshape(1, d_emb))


def force_mlp_forward(ft, contact_force, params, *, tile_b=4096,
                      activation_dtype=jnp.float32):
    """ft: [B, 64], contact_force: [B, 3].  Returns (x [B, d_emb], ft_hidden [B, d_cnt])."""
    w1_pad, b1_row, w2a, w2b_pad, b2_row = params
    B = ft.shape[0]
    d_cnt = w1_pad.shape[1]
    d_emb = w2a.shape[1]
    adt = jnp.dtype(activation_dtype)

    # Single lane-dense input slab [ft | cf | 0] -> one 128-lane DMA stream
    # instead of two lane-padded narrow streams.
    slab = jnp.concatenate(
        [ft.astype(adt), contact_force.astype(adt),
         jnp.zeros((B, SLAB_W - _FT_W - _CF_W), adt)], axis=1)

    # Batch tile: large (per-grid-step overhead dominates otherwise), sublane
    # aligned; keep >=2 tiles for v7x's two TensorCores when the batch is big.
    TILE_B = min(tile_b, _round_up(max(B, 1), 16))
    if B > 2048 and pl.cdiv(B, TILE_B) < 2:
        TILE_B = _round_up(pl.cdiv(B, 2), 16)
    grid = (pl.cdiv(B, TILE_B),)        # partial tail block handled by Pallas

    # Scoped-VMEM budget: double-buffered activations + resident weights, with
    # headroom; portable to v5e's 16 MiB default and v7x's 64 MiB physical.
    per_row_vmem = (SLAB_W + _round_up(d_emb, 128) + _round_up(d_cnt, 128)) * adt.itemsize
    weight_vmem = sum(int(p.size) * p.dtype.itemsize for p in params)
    vmem_needed = 2 * TILE_B * per_row_vmem + 2 * weight_vmem
    vmem_limit = int(min(max(vmem_needed + (8 << 20), 32 << 20), 56 << 20))

    # Advisory cost hint (kernel is HBM-BW bound); counts lane-padded traffic.
    flops = 2 * B * (_FT_W * d_cnt + (d_cnt + _CF_W) * d_emb)
    bytes_accessed = (B * per_row_vmem) + weight_vmem

    x_out, h_out = pl.pallas_call(
        force_mlp_kernel,
        out_shape=(jax.ShapeDtypeStruct((B, d_emb), adt),
                   jax.ShapeDtypeStruct((B, d_cnt), adt)),
        grid=grid,
        in_specs=[
            # Batch-tiled activation slab.
            pl.BlockSpec((TILE_B, SLAB_W), lambda i: (i, 0)),
            # Weights/biases: constant index_map -> DMA'd once, resident in VMEM.
            pl.BlockSpec((SLAB_W, d_cnt), lambda i: (0, 0)),
            pl.BlockSpec((1, d_cnt), lambda i: (0, 0)),
            pl.BlockSpec((d_cnt, d_emb), lambda i: (0, 0)),
            pl.BlockSpec((SLAB_W, d_emb), lambda i: (0, 0)),
            pl.BlockSpec((1, d_emb), lambda i: (0, 0)),
        ],
        out_specs=(pl.BlockSpec((TILE_B, d_emb), lambda i: (i, 0)),
                   pl.BlockSpec((TILE_B, d_cnt), lambda i: (i, 0))),
        compiler_params=pltpu.CompilerParams(
            dimension_semantics=("parallel",),   # shard batch tiles on v7x's 2 TCs
            vmem_limit_bytes=vmem_limit,
        ),
        cost_estimate=pl.CostEstimate(
            flops=flops, transcendentals=0, bytes_accessed=bytes_accessed),
    )(slab, w1_pad, b1_row, w2a, w2b_pad, b2_row)

    return x_out, h_out


if __name__ == "__main__":
    # Small shapes implied by the module: ft has 64 features, contact_force has 3.
    d_cnt_code = 32
    d_force_emb = 32

    key = jax.random.PRNGKey(0)
    k_ft, k_cf, k_w1, k_b1, k_w2, k_b2 = jax.random.split(key, 6)

    # torch Linear layout: weight [out, in].
    w1 = jax.random.normal(k_w1, (d_cnt_code, 64), dtype=jnp.float32) * 0.1
    b1 = jax.random.normal(k_b1, (d_cnt_code,), dtype=jnp.float32) * 0.1
    w2 = jax.random.normal(k_w2, (d_force_emb, d_cnt_code + 3), dtype=jnp.float32) * 0.1
    b2 = jax.random.normal(k_b2, (d_force_emb,), dtype=jnp.float32) * 0.1

    def reference(ft, cf):
        h = jnp.maximum(ft @ w1.T + b1, 0.0)
        x = jnp.concatenate([h, cf], axis=1) @ w2.T + b2
        return x, h

    # Params prepared once (hoisted out of the per-call path).
    params_f32 = prepare_force_mlp_params(w1, b1, w2, b2)

    # (B, tile_b): second case exercises a multi-tile grid + non-divisible tail
    # (no jnp.pad; Pallas handles the partial last block).
    for B, tb in ((8, 4096), (20, 16)):
        ft = jax.random.normal(jax.random.fold_in(k_ft, B), (B, 64), dtype=jnp.float32)
        cf = jax.random.normal(jax.random.fold_in(k_cf, B), (B, 3), dtype=jnp.float32)

        x_out, h_out = force_mlp_forward(ft, cf, params_f32, tile_b=tb)
        jax.block_until_ready((x_out, h_out))

        x_ref, h_ref = reference(ft, cf)
        assert jnp.allclose(h_out, h_ref, atol=1e-5, rtol=1e-5)
        assert jnp.allclose(x_out, x_ref, atol=1e-5, rtol=1e-5)

    # Opt-in bf16 activation/output fast path (f32 accumulation), loose tolerance.
    params_bf16 = prepare_force_mlp_params(w1, b1, w2, b2,
                                           activation_dtype=jnp.bfloat16)
    B = 20
    ft = jax.random.normal(jax.random.fold_in(k_ft, B), (B, 64), dtype=jnp.float32)
    cf = jax.random.normal(jax.random.fold_in(k_cf, B), (B, 3), dtype=jnp.float32)
    x_bf, h_bf = force_mlp_forward(ft, cf, params_bf16, tile_b=16,
                                   activation_dtype=jnp.bfloat16)
    jax.block_until_ready((x_bf, h_bf))
    x_ref, h_ref = reference(ft, cf)
    assert float(jnp.max(jnp.abs(h_bf.astype(jnp.float32) - h_ref))) < 0.1
    assert float(jnp.max(jnp.abs(x_bf.astype(jnp.float32) - x_ref))) < 0.1

    print("KERNEL_OK")
</pallas_src>

<mosaic_0001>
module attributes {stable_mosaic.version = 11 : i64} {
  func.func @force_mlp_kernel(%arg0: i32, %arg1: memref<16x128xf32, #tpu.memory_space<vmem>>, %arg2: memref<128x32xf32, #tpu.memory_space<vmem>>, %arg3: memref<1x32xf32, #tpu.memory_space<vmem>>, %arg4: memref<32x32xf32, #tpu.memory_space<vmem>>, %arg5: memref<128x32xf32, #tpu.memory_space<vmem>>, %arg6: memref<1x32xf32, #tpu.memory_space<vmem>>, %arg7: memref<16x32xf32, #tpu.memory_space<vmem>>, %arg8: memref<16x32xf32, #tpu.memory_space<vmem>>) attributes {dimension_semantics = [#tpu.dimension_semantics<parallel>], iteration_bounds = array<i64: 1>, scalar_prefetch = 0 : i64, scratch_operands = 0 : i64, tpu.core_type = #tpu.core_type<tc>, window_params = [{transform_indices = @transform_0, window_bounds = array<i64: 16, 128>}, {pipeline_mode = #tpu.pipeline_mode<synchronous>, transform_indices = @transform_1, window_bounds = array<i64: 128, 32>}, {pipeline_mode = #tpu.pipeline_mode<synchronous>, transform_indices = @transform_2, window_bounds = array<i64: 1, 32>}, {pipeline_mode = #tpu.pipeline_mode<synchronous>, transform_indices = @transform_3, window_bounds = array<i64: 32, 32>}, {pipeline_mode = #tpu.pipeline_mode<synchronous>, transform_indices = @transform_4, window_bounds = array<i64: 128, 32>}, {pipeline_mode = #tpu.pipeline_mode<synchronous>, transform_indices = @transform_5, window_bounds = array<i64: 1, 32>}, {transform_indices = @transform_6, window_bounds = array<i64: 16, 32>}, {transform_indices = @transform_7, window_bounds = array<i64: 16, 32>}]} {
    %c0 = arith.constant 0 : index
    %c0_0 = arith.constant 0 : index
    %0 = vector.load %arg1[%c0, %c0_0] : memref<16x128xf32, #tpu.memory_space<vmem>>, vector<16x128xf32>
    %c0_1 = arith.constant 0 : index
    %c0_2 = arith.constant 0 : index
    %1 = vector.load %arg2[%c0_1, %c0_2] : memref<128x32xf32, #tpu.memory_space<vmem>>, vector<128x32xf32>
    %cst = arith.constant dense<0.000000e+00> : vector<16x32xf32>
    %2 = tpu.matmul %0, %1, %cst {dimension_numbers = #tpu.dot_dimension_numbers<[1], [0], [0], [1], [0, 0, 1, 1], [], []>} : vector<16x128xf32>, vector<128x32xf32>, vector<16x32xf32> -> vector<16x32xf32>
    %c0_3 = arith.constant 0 : index
    %c0_4 = arith.constant 0 : index
    %3 = vector.load %arg3[%c0_3, %c0_4] : memref<1x32xf32, #tpu.memory_space<vmem>>, vector<1x32xf32>
    %4 = vector.broadcast %3 : vector<1x32xf32> to vector<16x32xf32>
    %5 = arith.addf %2, %4 : vector<16x32xf32>
    %cst_5 = arith.constant 0.000000e+00 : f32
    %6 = vector.broadcast %cst_5 : f32 to vector<16x32xf32>
    %7 = arith.maximumf %5, %6 : vector<16x32xf32>
    %c0_6 = arith.constant 0 : index
    %c0_7 = arith.constant 0 : index
    %8 = vector.load %arg4[%c0_6, %c0_7] : memref<32x32xf32, #tpu.memory_space<vmem>>, vector<32x32xf32>
    %cst_8 = arith.constant dense<0.000000e+00> : vector<16x32xf32>
    %9 = tpu.matmul %7, %8, %cst_8 {dimension_numbers = #tpu.dot_dimension_numbers<[1], [0], [0], [1], [0, 0, 1, 1], [], []>} : vector<16x32xf32>, vector<32x32xf32>, vector<16x32xf32> -> vector<16x32xf32>
    %c0_9 = arith.constant 0 : index
    %c0_10 = arith.constant 0 : index
    %10 = vector.load %arg5[%c0_9, %c0_10] : memref<128x32xf32, #tpu.memory_space<vmem>>, vector<128x32xf32>
    %cst_11 = arith.constant dense<0.000000e+00> : vector<16x32xf32>
    %11 = tpu.matmul %0, %10, %cst_11 {dimension_numbers = #tpu.dot_dimension_numbers<[1], [0], [0], [1], [0, 0, 1, 1], [], []>} : vector<16x128xf32>, vector<128x32xf32>, vector<16x32xf32> -> vector<16x32xf32>
    %12 = arith.addf %9, %11 : vector<16x32xf32>
    %c0_12 = arith.constant 0 : index
    %c0_13 = arith.constant 0 : index
    %13 = vector.load %arg6[%c0_12, %c0_13] : memref<1x32xf32, #tpu.memory_space<vmem>>, vector<1x32xf32>
    %14 = vector.broadcast %13 : vector<1x32xf32> to vector<16x32xf32>
    %15 = arith.addf %12, %14 : vector<16x32xf32>
    %c0_14 = arith.constant 0 : index
    %c0_15 = arith.constant 0 : index
    %16 = vector.load %arg7[%c0_14, %c0_15] : memref<16x32xf32, #tpu.memory_space<vmem>>, vector<16x32xf32>
    tpu.vector_store %arg7[%c0_14, %c0_15], %15 {strides = array<i32>} : memref<16x32xf32, #tpu.memory_space<vmem>>, vector<16x32xf32>,
    %c0_16 = arith.constant 0 : index
    %c0_17 = arith.constant 0 : index
    %17 = vector.load %arg8[%c0_16, %c0_17] : memref<16x32xf32, #tpu.memory_space<vmem>>, vector<16x32xf32>
    tpu.vector_store %arg8[%c0_16, %c0_17], %7 {strides = array<i32>} : memref<16x32xf32, #tpu.memory_space<vmem>>, vector<16x32xf32>,
    return
  }
  func.func @transform_0(%arg0: i32) -> (i32, i32) {
    %c0_i32 = arith.constant 0 : i32
    %c0_i32_0 = arith.constant 0 : i32
    return %arg0, %c0_i32 : i32, i32
  }
  func.func @transform_1(%arg0: i32) -> (i32, i32) {
    %c0_i32 = arith.constant 0 : i32
    %c0_i32_0 = arith.constant 0 : i32
    %c0_i32_1 = arith.constant 0 : i32
    return %c0_i32, %c0_i32_0 : i32, i32
  }
  func.func @transform_2(%arg0: i32) -> (i32, i32) {
    %c0_i32 = arith.constant 0 : i32
    %c0_i32_0 = arith.constant 0 : i32
    %c0_i32_1 = arith.constant 0 : i32
    return %c0_i32, %c0_i32_0 : i32, i32
  }
  func.func @transform_3(%arg0: i32) -> (i32, i32) {
    %c0_i32 = arith.constant 0 : i32
    %c0_i32_0 = arith.constant 0 : i32
    %c0_i32_1 = arith.constant 0 : i32
    return %c0_i32, %c0_i32_0 : i32, i32
  }
  func.func @transform_4(%arg0: i32) -> (i32, i32) {
    %c0_i32 = arith.constant 0 : i32
    %c0_i32_0 = arith.constant 0 : i32
    %c0_i32_1 = arith.constant 0 : i32
    return %c0_i32, %c0_i32_0 : i32, i32
  }
  func.func @transform_5(%arg0: i32) -> (i32, i32) {
    %c0_i32 = arith.constant 0 : i32
    %c0_i32_0 = arith.constant 0 : i32
    %c0_i32_1 = arith.constant 0 : i32
    return %c0_i32, %c0_i32_0 : i32, i32
  }
  func.func @transform_6(%arg0: i32) -> (i32, i32) {
    %c0_i32 = arith.constant 0 : i32
    %c0_i32_0 = arith.constant 0 : i32
    return %arg0, %c0_i32 : i32, i32
  }
  func.func @transform_7(%arg0: i32) -> (i32, i32) {
    %c0_i32 = arith.constant 0 : i32
    %c0_i32_0 = arith.constant 0 : i32
    return %arg0, %c0_i32 : i32, i32
  }
}

</mosaic_0001>

<bundles_post_ra>
// kernel: tpu_custom_call.1
= control target key start
LH: loop header
LB: loop body
LE: loop exit
PB: predicated region body
PF: predicated region fallthrough
CT: control target
= control target key end

     0   :  { %13 = vsyncpa [#allocation3], 0  ;;  %s792_s0 = inlined_call_operand.vmem [shape: f32[8,128], index: 0, kind: input, shape index: {}]   ;;  %s793_s1 = inlined_call_operand.vmem [shape: f32[128,32], index: 1, kind: input, shape index: {}]   ;;  %s794_s2 = inlined_call_operand.vmem [shape: f32[1,32], index: 2, kind: input, shape index: {}]   ;;  %s795_s3 = inlined_call_operand.vmem [shape: f32[32,32], index: 3, kind: input, shape index: {}]   ;;  %s796_s4 = inlined_call_operand.vmem [shape: f32[128,32], index: 4, kind: input, shape index: {}]   ;;  %s797_s5 = inlined_call_operand.vmem [shape: f32[1,32], index: 5, kind: input, shape index: {}]   ;;  %s798_s6 = inlined_call_operand.hbm [shape: f32[8,32], index: 6, kind: output, shape index: {0}]   ;;  %s799_s7 = inlined_call_operand.hbm [shape: f32[8,32], index: 7, kind: output, shape index: {1}]  }
   0x1   :  { %14 = vsyncpa [#allocation5], 0  ;;  %v29_v0 = vld [vmem:[%s793_s1] sm:$0xff]  ;;  %v30_v1 = vld [vmem:[%s793_s1 + $0x8] sm:$0xff]  ;;  %vm224_vm0 = vcmask 261120  }
   0x2   :  { %v478_v2 = vpack.c.bf16 %v30_v1, %v29_v0  ;;  %v31_v3 = vld [vmem:[%s793_s1 + $0x10] sm:$0xff]  ;;  %v32_v4 = vld [vmem:[%s793_s1 + $0x18] sm:$0xff]  ;;  %v33_v6 = vld [vmem:[%s793_s1 + $0x20] sm:$0xff] }
   0x3   :  { %v482_v5 = vpack.c.bf16 %v32_v4, %v31_v3  ;;  %v34_v7 = vld [vmem:[%s793_s1 + $0x28] sm:$0xff]  ;;  %v35_v9 = vld [vmem:[%s793_s1 + $0x30] sm:$0xff]  ;;  %v27_v10 = vld [vmem:[%s792_s0] sm:$0xff] }
   0x4   :  { %479 = vmatprep.subr.bf16.mxu0 %v478_v2  ;;  %v486_v8 = vpack.c.bf16 %v34_v7, %v33_v6  ;;  %v36_v11 = vld [vmem:[%s793_s1 + $0x38] sm:$0xff]  ;;  %429 = vmatprep.mubr.f32.mxu0 %v27_v10  ;;  %v133_v12 = vld [vmem:[%s796_s4] sm:$0xff]  ;;  %v134_v13 = vld [vmem:[%s796_s4 + $0x8] sm:$0xff] }
   0x5   :  { %481 = vmatpush3.bf16.msra.mxu0 %v478_v2  ;;  %464 = vmatprep.mubr.f32.mxu1 %v27_v10  ;;  %v510_v14 = vpack.c.bf16 %v134_v13, %v133_v12  ;;  %v135_v15 = vld [vmem:[%s796_s4 + $0x10] sm:$0xff]  ;;  %v136_v16 = vld [vmem:[%s796_s4 + $0x18] sm:$0xff]  ;;  %v137_v18 = vld [vmem:[%s796_s4 + $0x20] sm:$0xff]  ;;  %v490_v20 = vpack.c.bf16 %v36_v11, %v35_v9 }
   0x6   :  { %483 = vmatprep.subr.bf16.mxu0 %v482_v5  ;;  %v514_v17 = vpack.c.bf16 %v136_v16, %v135_v15  ;;  %v138_v19 = vld [vmem:[%s796_s4 + $0x28] sm:$0xff]  ;;  %v37_v21 = vld [vmem:[%s793_s1 + $0x40] sm:$0xff]  ;;  %v139_v24 = vld [vmem:[%s796_s4 + $0x30] sm:$0xff] }
   0x7   :  { %511 = vmatprep.subr.bf16.mxu1 %v510_v14  ;;  %v38_v22 = vld [vmem:[%s793_s1 + $0x48] sm:$0xff]  ;;  %v518_v23 = vpack.c.bf16 %v138_v19, %v137_v18  ;;  %v140_v25 = vld [vmem:[%s796_s4 + $0x38] sm:$0xff]  ;;  %v39_v27 = vld [vmem:[%s793_s1 + $0x50] sm:$0xff] }
   0x8   :  { %513 = vmatpush3.bf16.msra.mxu1 %v510_v14  ;;  %v494_v26 = vpack.c.bf16 %v38_v22, %v37_v21  ;;  %v40_v28 = vld [vmem:[%s793_s1 + $0x58] sm:$0xff]  ;;  %v522_v29 = vpack.c.bf16 %v140_v25, %v139_v24  ;;  %v141_v30 = vld [vmem:[%s796_s4 + $0x40] sm:$0xff]  ;;  %v142_v31 = vld [vmem:[%s796_s4 + $0x48] sm:$0xff] }
   0x9   :  { %485 = vmatpush3.bf16.msra.mxu0 %v482_v5  ;;  %515 = vmatprep.subr.bf16.mxu1 %v514_v17  ;;  %v498_v32 = vpack.c.bf16 %v40_v28, %v39_v27  ;;  %v41_v33 = vld [vmem:[%s793_s1 + $0x60] sm:$0xff]  ;;  %v42_v34 = vld [vmem:[%s793_s1 + $0x68] sm:$0xff]  ;;  %v526_v35 = vpack.c.bf16 %v142_v31, %v141_v30  ;;  %v143_v36 = vld [vmem:[%s796_s4 + $0x50] sm:$0xff] }
   0xa   :  { %487 = vmatprep.subr.bf16.mxu0 %v486_v8  ;;  %v144_v37 = vld [vmem:[%s796_s4 + $0x58] sm:$0xff]  ;;  %v502_v38 = vpack.c.bf16 %v42_v34, %v41_v33  ;;  %v43_v39 = vld [vmem:[%s793_s1 + $0x70] sm:$0xff]  ;;  %v145_v42 = vld [vmem:[%s796_s4 + $0x60] sm:$0xff] }
   0xb   :  { %v44_v40 = vld [vmem:[%s793_s1 + $0x78] sm:$0xff]  ;;  %v530_v41 = vpack.c.bf16 %v144_v37, %v143_v36  ;;  %v146_v43 = vld [vmem:[%s796_s4 + $0x68] sm:$0xff]  ;;  %v147_v46 = vld [vmem:[%s796_s4 + $0x70] sm:$0xff] }
   0xc   :  { %517 = vmatpush3.bf16.msra.mxu1 %v514_v17  ;;  %v506_v44 = vpack.c.bf16 %v44_v40, %v43_v39  ;;  %v534_v45 = vpack.c.bf16 %v146_v43, %v145_v42  ;;  %v148_v47 = vld [vmem:[%s796_s4 + $0x78] sm:$0xff]  ;;  %v28_v49 = vld [vmem:[%s792_s0 + $0x8] sm:$0xff]  ;;  %v129_v50 = vld [vmem:[%s795_s3] sm:$0xff] }
   0xd   :  { %489 = vmatpush3.bf16.msra.mxu0 %v486_v8  ;;  %519 = vmatprep.subr.bf16.mxu1 %v518_v23  ;;  %v538_v48 = vpack.c.bf16 %v148_v47, %v147_v46  ;;  %v130_v51 = vld [vmem:[%s795_s3 + $0x8] sm:$0xff]  ;;  %v131_v53 = vld [vmem:[%s795_s3 + $0x10] sm:$0xff]  ;;  %v132_v54 = vld [vmem:[%s795_s3 + $0x18] sm:$0xff] }
   0xe   :  { %491 = vmatprep.subr.bf16.mxu0 %v490_v20  ;;  %v542_v52 = vpack.c.bf16 %v130_v51, %v129_v50  ;;  %v546_v55 = vpack.c.bf16 %v132_v54, %v131_v53  ;;  %v351_v56 = vld [vmem:[%s794_s2] ss:$0 sm:$0xff] }
   0xf   :  { %v354_v63 = vld [vmem:[%s797_s5] ss:$0 sm:$0xff] }
  0x10   :  { %521 = vmatpush3.bf16.msra.mxu1 %v518_v23 }
  0x11   :  { %493 = vmatpush3.bf16.msra.mxu0 %v490_v20  ;;  %523 = vmatprep.subr.bf16.mxu1 %v522_v29 }
  0x12   :  { %495 = vmatprep.subr.bf16.mxu0 %v494_v26 }
  0x14   :  { %525 = vmatpush3.bf16.msra.mxu1 %v522_v29 }
  0x15   :  { %497 = vmatpush3.bf16.msra.mxu0 %v494_v26  ;;  %527 = vmatprep.subr.bf16.mxu1 %v526_v35 }
  0x16   :  { %499 = vmatprep.subr.bf16.mxu0 %v498_v32 }
  0x18   :  { %529 = vmatpush3.bf16.msra.mxu1 %v526_v35 }
  0x19   :  { %501 = vmatpush3.bf16.msra.mxu0 %v498_v32  ;;  %531 = vmatprep.subr.bf16.mxu1 %v530_v41 }
  0x1a   :  { %503 = vmatprep.subr.bf16.mxu0 %v502_v38 }
  0x1c   :  { %533 = vmatpush3.bf16.msra.mxu1 %v530_v41 }
  0x1d   :  { %505 = vmatpush3.bf16.msra.mxu0 %v502_v38  ;;  %535 = vmatprep.subr.bf16.mxu1 %v534_v45 }
  0x1e   :  { %507 = vmatprep.subr.bf16.mxu0 %v506_v44 }
  0x20   :  { %537 = vmatpush3.bf16.msra.mxu1 %v534_v45 }
  0x21   :  { %509 = vmatpush3.bf16.msra.mxu0 %v506_v44  ;;  %539 = vmatprep.subr.bf16.mxu1 %v538_v48 }
  0x24   :  { %430 = vmatmul.mubr.f32.vlgmr.msra.gmra.mrb[0].mxu0 %v28_v49  ;;  %541 = vmatpush3.bf16.msra.mxu1 %v538_v48 }
  0x25   :  { %543 = vmatprep.subr.bf16.mxu1 %v542_v52 }
  0x27   :  { %465 = vmatmul.mubr.f32.vlgmr.msra.gmra.mrb[0].mxu1 %v28_v49 }
  0x28   :  { %545 = vmatpush3.bf16.msra.mxu1 %v542_v52 }
  0x29   :  { %547 = vmatprep.subr.bf16.mxu1 %v546_v55 }
  0x2c   :  { %549 = vmatpush3.bf16.msra.mxu1 %v546_v55 }
  0xf7   :  { %v431_v57 = vpop.f32.mrb[0].mxu0 }
  0xf8   :  { %v124_v58 = vadd.f32 %v431_v57, %v351_v56  ;;  %v118_v59 = vpop.f32.mrb[1].mxu0 }
  0xf9   :  { %v119_v60 = vadd.f32 %v351_v56, %v118_v59 }
  0xfa   :  { %v128_v61 = vmax.f32 %v124_v58, 0.0 }
  0xfb   :  { %v127_v62 = vmax.f32 %v119_v60, 0.0 }
  0xfc   :  { %318 = vst.msk [vmem:[#allocation4 + $0x8] sm:$0xff] %vm224_vm0, %v128_v61 }
  0xfd   :  { %317 = vst.msk [vmem:[#allocation4] sm:$0xff] %vm224_vm0, %v127_v62  ;;  %475 = vmatprep.mubr.msk.f32.mxu1 %vm224_vm0, %v127_v62 }
  0xfe   :  { %476 = vmatmul.mubr.msk.f32.vlgmr.msra.gmra.mrb[0].mxu1 %vm224_vm0, %v128_v61 }
 0x1d1   :  { %v477_v0 = vpop.f32.mrb[0].mxu1 }
 0x1d2   :  { %v314_v1 = vadd.f32 %v477_v0, %v354_v63  ;;  %v297_v2 = vpop.f32.mrb[1].mxu1 }
 0x1d3   :  { %v313_v3 = vadd.f32 %v354_v63, %v297_v2 }
 0x1d4   :  { %316 = vst.msk [vmem:[#allocation2 + $0x8] sm:$0xff] %vm224_vm0, %v314_v1 }
 0x1d5   :  { %315 = vst.msk [vmem:[#allocation2] sm:$0xff] %vm224_vm0, %v313_v3 }
 0x1d6   :  { %323 = vsyncadd [#allocation3], 128  ;;  %s604_s2 = smov [#allocation2]  }
 0x1d7   :  { %s324_s8 = sshll.u32 %s604_s2, 4  ;;  %s325_s8 = int_to_ptr.vmem [resolvable:$true] %s324_s8 }
 0x1d8   :  { %s556_s9 = scalar_lea.vmem %s325_s8, 128  ;;  %s560_s10 = scalar_lea.vmem %s325_s8, 256 }
 0x1d9   :  { %p557_p0 = scmp.ne.s32.totalorder %s325_s8, %s556_s9  ;;  %p561_p1 = scmp.lt.s32.totalorder %s325_s8, %s325_s8 }
 0x1da   :  { %p562_p2 = scmp.lt.s32.totalorder %s560_s10, %s556_s9 }
 0x1dc   :  { %p563_p3 = por %p562_p2, %p561_p1 }
 0x1de   :  { %p564_p4 = pnand %p563_p3, %p557_p0 }
 0x1e0   :  { %567 = shalt.err (!%p564_p4)
}
 0x1e1   :  { %s568_s12 = scalar_lea.hbm %s798_s6, 128 }
 0x1e2   :  { %p569_p5 = scmp.ne.s32.totalorder %s798_s6, %s568_s12  ;;  %p572_p6 = scmp.lt.u32.totalorder %s568_s12, %s798_s6 }
 0x1e4   :  { %p574_p7 = pnand %p572_p6, %p569_p5 }
 0x1e6   :  { %577 = shalt.err (!%p574_p7)
}
 0x1e7   :  { %s605_s17 = smov 128   ;;  %s606_s1 = smov 8  }
 0x1e8   :  { %330 = dma.vmem_to_hbm [thread:$0]  %s325_s8, 128, %s798_s6, [#allocation3], %s605_s17, %s605_s17, %s606_s1  }
 0x1e9   :  { %335 = vsyncadd [#allocation5], 128  ;;  %s607_s20 = smov [#allocation4]  }
 0x1ea   :  { %s336_s21 = sshll.u32 %s607_s20, 4  ;;  %s337_s21 = int_to_ptr.vmem [resolvable:$true] %s336_s21 }
 0x1eb   :  { %s578_s22 = scalar_lea.vmem %s337_s21, 128  ;;  %s582_s23 = scalar_lea.vmem %s337_s21, 256 }
 0x1ec   :  { %p579_p8 = scmp.ne.s32.totalorder %s337_s21, %s578_s22  ;;  %p583_p9 = scmp.lt.s32.totalorder %s337_s21, %s337_s21 }
 0x1ed   :  { %p584_p10 = scmp.lt.s32.totalorder %s582_s23, %s578_s22 }
 0x1ef   :  { %p585_p11 = por %p584_p10, %p583_p9 }
 0x1f1   :  { %p586_p12 = pnand %p585_p11, %p579_p8 }
 0x1f3   :  { %589 = shalt.err (!%p586_p12)
}
 0x1f4   :  { %s590_s4 = scalar_lea.hbm %s799_s7, 128 }
 0x1f5   :  { %p591_p13 = scmp.ne.s32.totalorder %s799_s7, %s590_s4  ;;  %p594_p0 = scmp.lt.u32.totalorder %s590_s4, %s799_s7 }
 0x1f7   :  { %p596_p1 = pnand %p594_p0, %p591_p13 }
 0x1f9   :  { %599 = shalt.err (!%p596_p1)
}
 0x1fa   :  { %342 = dma.vmem_to_hbm [thread:$0]  %s337_s21, 128, %s799_s7, [#allocation5], %s605_s17, %s605_s17, %s606_s1  }
 0x1fb   :  { %600 = dma.done.wait [#allocation3], 256  }
 0x1fc   :  { %601 = vsyncadd [#allocation3], 4294967040 }
 0x1fd   :  { %602 = dma.done.wait [#allocation5], 256  }
 0x1fe   :  { %603 = vsyncadd [#allocation5], 4294967040 }
 0x1ff   :  { %349 = vsyncpa [#allocation3], 1 }
 0x200   :  { %350 = vsyncpa [#allocation5], 1 }

</bundles_post_ra>
